<compile_context>
chip_gen: v7x
topology: tpu7x:2x2x1
jax: 0.10.0
libtpu: 0.0.40
codegen_flags: <defaults>
</compile_context>

<pallas_src>
import jax
import jax.numpy as jnp
from jax.experimental import pallas as pl
from jax.experimental.pallas import tpu as pltpu


def _linear_sigmoid_kernel(x_ref, wt_ref, b_ref, o_ref):
    # x_ref: (TB, D_in)   wt_ref: (D_in, D_out)   b_ref: (1, D_out)
    # o_ref: (TB, D_out)
    logits = jnp.dot(
        x_ref[...], wt_ref[...], preferred_element_type=jnp.float32
    ) + b_ref[...]
    # sigmoid(z) == 0.5 * tanh(0.5 * z) + 0.5  -> one EUP op per element.
    o_ref[...] = (0.5 * jnp.tanh(0.5 * logits) + 0.5).astype(o_ref.dtype)


def _round_up(n, m):
    return ((n + m - 1) // m) * m


def prepare_params(weight, bias):
    """One-time parameter prep (hoisted out of the per-call path).

    weight: (output_size, input_size)  -- PyTorch nn.Linear layout
    bias:   (output_size,)
    Returns (w_t, b2): w_t is (input_size, output_size), b2 is (1, output_size) f32.
    """
    w_t = jnp.asarray(weight).T
    b2 = jnp.asarray(bias).reshape(1, -1).astype(jnp.float32)
    return w_t, b2


def _choose_batch_tile(B, D_in, D_out, itemsize, vmem_budget_bytes):
    # Double-buffered x tile + out tile, per row.
    per_row = 2 * (D_in + D_out) * itemsize
    tb = max(8, (vmem_budget_bytes // per_row) // 8 * 8)
    if B > 8:
        # v7x megacore: keep >= 2 grid steps so "parallel" spans both TCs.
        tb = min(tb, _round_up(pl.cdiv(B, 2), 8))
    return min(tb, _round_up(B, 8))


def speaker_classifier(x, w_t, b2, *, out_dtype=None, vmem_budget_bytes=8 << 20):
    """Forward pass of SpeakerClassifier.

    x:   (B, input_size)
    w_t: (input_size, output_size)   (prepared with prepare_params)
    b2:  (1, output_size) float32
    """
    B, D_in = x.shape
    D_out = w_t.shape[1]
    out_dtype = x.dtype if out_dtype is None else jnp.dtype(out_dtype)

    itemsize = max(x.dtype.itemsize, 4)
    TB = _choose_batch_tile(B, D_in, D_out, itemsize, vmem_budget_bytes)
    # Ragged last block is fine: per-row op, masked output stores.
    grid = (pl.cdiv(B, TB),)

    footprint = (2 * TB * (D_in + D_out) * itemsize          # double-buffered x/out
                 + D_in * D_out * w_t.dtype.itemsize         # resident weight
                 + D_out * 4)                                 # resident bias
    vmem_limit = int(min(32 << 20, max(2 * footprint, 4 << 20)))

    cost = pl.CostEstimate(
        flops=2 * B * D_in * D_out,
        transcendentals=B * D_out,                            # one tanh per element
        bytes_accessed=(B * D_in * x.dtype.itemsize
                        + D_in * D_out * w_t.dtype.itemsize
                        + D_out * 4
                        + B * D_out * jnp.dtype(out_dtype).itemsize),
    )

    return pl.pallas_call(
        _linear_sigmoid_kernel,
        out_shape=jax.ShapeDtypeStruct((B, D_out), out_dtype),
        grid=grid,
        in_specs=[
            pl.BlockSpec((TB, D_in), lambda i: (i, 0)),      # x tile (pipelined)
            pl.BlockSpec((D_in, D_out), lambda i: (0, 0)),   # weight (VMEM-resident)
            pl.BlockSpec((1, D_out), lambda i: (0, 0)),      # bias   (VMEM-resident)
        ],
        out_specs=pl.BlockSpec((TB, D_out), lambda i: (i, 0)),
        compiler_params=pltpu.CompilerParams(
            dimension_semantics=("parallel",),
            vmem_limit_bytes=vmem_limit,
        ),
        cost_estimate=cost,
    )(x, w_t, b2)


if __name__ == "__main__":
    # Small shapes consistent with the module: batch=8, input_size=32, output_size=16
    batch, input_size, output_size = 8, 32, 16

    key = jax.random.PRNGKey(0)
    kx, kw, kb = jax.random.split(key, 3)

    x = jax.random.normal(kx, (batch, input_size), dtype=jnp.float32)
    # Deterministic init mimicking nn.Linear's uniform(-1/sqrt(in), 1/sqrt(in))
    bound = 1.0 / jnp.sqrt(jnp.float32(input_size))
    weight = jax.random.uniform(kw, (output_size, input_size),
                                minval=-bound, maxval=bound, dtype=jnp.float32)
    bias = jax.random.uniform(kb, (output_size,),
                              minval=-bound, maxval=bound, dtype=jnp.float32)

    w_t, b2 = prepare_params(weight, bias)          # one-time param prep
    out = speaker_classifier(x, w_t, b2)
    out = jax.block_until_ready(out)

    # Correctness check against a pure-JAX reference of the PyTorch forward.
    ref = jax.nn.sigmoid(x @ weight.T + bias)
    assert out.shape == (batch, output_size)
    assert jnp.allclose(out, ref, atol=1e-4, rtol=1e-4), \
        float(jnp.max(jnp.abs(out - ref)))

    print("KERNEL_OK")
</pallas_src>

<mosaic_0001>
module attributes {stable_mosaic.version = 11 : i64} {
  func.func @_linear_sigmoid_kernel(%arg0: i32, %arg1: memref<8x32xf32, #tpu.memory_space<vmem>>, %arg2: memref<32x16xf32, #tpu.memory_space<vmem>>, %arg3: memref<1x16xf32, #tpu.memory_space<vmem>>, %arg4: memref<8x16xf32, #tpu.memory_space<vmem>>) attributes {dimension_semantics = [#tpu.dimension_semantics<parallel>], iteration_bounds = array<i64: 1>, scalar_prefetch = 0 : i64, scratch_operands = 0 : i64, tpu.core_type = #tpu.core_type<tc>, window_params = [{transform_indices = @transform_0, window_bounds = array<i64: 8, 32>}, {pipeline_mode = #tpu.pipeline_mode<synchronous>, transform_indices = @transform_1, window_bounds = array<i64: 32, 16>}, {pipeline_mode = #tpu.pipeline_mode<synchronous>, transform_indices = @transform_2, window_bounds = array<i64: 1, 16>}, {transform_indices = @transform_3, window_bounds = array<i64: 8, 16>}]} {
    %c0 = arith.constant 0 : index
    %c0_0 = arith.constant 0 : index
    %0 = vector.load %arg1[%c0, %c0_0] : memref<8x32xf32, #tpu.memory_space<vmem>>, vector<8x32xf32>
    %c0_1 = arith.constant 0 : index
    %c0_2 = arith.constant 0 : index
    %1 = vector.load %arg2[%c0_1, %c0_2] : memref<32x16xf32, #tpu.memory_space<vmem>>, vector<32x16xf32>
    %cst = arith.constant dense<0.000000e+00> : vector<8x16xf32>
    %2 = tpu.matmul %0, %1, %cst {dimension_numbers = #tpu.dot_dimension_numbers<[1], [0], [0], [1], [0, 0, 1, 1], [], []>} : vector<8x32xf32>, vector<32x16xf32>, vector<8x16xf32> -> vector<8x16xf32>
    %c0_3 = arith.constant 0 : index
    %c0_4 = arith.constant 0 : index
    %3 = vector.load %arg3[%c0_3, %c0_4] : memref<1x16xf32, #tpu.memory_space<vmem>>, vector<1x16xf32>
    %4 = vector.broadcast %3 : vector<1x16xf32> to vector<8x16xf32>
    %5 = arith.addf %2, %4 : vector<8x16xf32>
    %cst_5 = arith.constant 5.000000e-01 : f32
    %6 = vector.broadcast %cst_5 : f32 to vector<8x16xf32>
    %7 = arith.mulf %6, %5 : vector<8x16xf32>
    %8 = math.tanh %7 : vector<8x16xf32>
    %cst_6 = arith.constant 5.000000e-01 : f32
    %9 = vector.broadcast %cst_6 : f32 to vector<8x16xf32>
    %10 = arith.mulf %9, %8 : vector<8x16xf32>
    %cst_7 = arith.constant 5.000000e-01 : f32
    %11 = vector.broadcast %cst_7 : f32 to vector<8x16xf32>
    %12 = arith.addf %10, %11 : vector<8x16xf32>
    %c0_8 = arith.constant 0 : index
    %c0_9 = arith.constant 0 : index
    %13 = vector.load %arg4[%c0_8, %c0_9] : memref<8x16xf32, #tpu.memory_space<vmem>>, vector<8x16xf32>
    tpu.vector_store %arg4[%c0_8, %c0_9], %12 {strides = array<i32>} : memref<8x16xf32, #tpu.memory_space<vmem>>, vector<8x16xf32>,
    return
  }
  func.func @transform_0(%arg0: i32) -> (i32, i32) {
    %c0_i32 = arith.constant 0 : i32
    %c0_i32_0 = arith.constant 0 : i32
    return %arg0, %c0_i32 : i32, i32
  }
  func.func @transform_1(%arg0: i32) -> (i32, i32) {
    %c0_i32 = arith.constant 0 : i32
    %c0_i32_0 = arith.constant 0 : i32
    %c0_i32_1 = arith.constant 0 : i32
    return %c0_i32, %c0_i32_0 : i32, i32
  }
  func.func @transform_2(%arg0: i32) -> (i32, i32) {
    %c0_i32 = arith.constant 0 : i32
    %c0_i32_0 = arith.constant 0 : i32
    %c0_i32_1 = arith.constant 0 : i32
    return %c0_i32, %c0_i32_0 : i32, i32
  }
  func.func @transform_3(%arg0: i32) -> (i32, i32) {
    %c0_i32 = arith.constant 0 : i32
    %c0_i32_0 = arith.constant 0 : i32
    return %arg0, %c0_i32 : i32, i32
  }
}

</mosaic_0001>

<bundles_post_ra>
// kernel: tpu_custom_call.1
= control target key start
LH: loop header
LB: loop body
LE: loop exit
PB: predicated region body
PF: predicated region fallthrough
CT: control target
= control target key end

     0   :  { %v175_v3 = vmov 0.0|0.0   ;;  %vm176_vm0 = vmmov 0   ;;  %v177_v6 = vmov 0.0   ;;  %s229_s0 = inlined_call_operand.vmem [shape: f32[8,32], index: 0, kind: input, shape index: {}]   ;;  %s230_s1 = inlined_call_operand.vmem [shape: f32[32,16], index: 1, kind: input, shape index: {}]   ;;  %s231_s2 = inlined_call_operand.vmem [shape: f32[1,16], index: 2, kind: input, shape index: {}]   ;;  %s232_s3 = inlined_call_operand.hbm [shape: f32[8,16], index: 3, kind: output, shape index: {}]  }
   0x1   :  { %v16_v0 = vld [vmem:[%s230_s1] sm:$0xff]  ;;  %v17_v1 = vld [vmem:[%s230_s1 + $0x8] sm:$0xff]  ;;  %v18_v2 = vld [vmem:[%s230_s1 + $0x10] sm:$0xff]  ;;  %139 = vmatprep.subr.bf16.mxu0 %v175_v3  ;;  %136 = vmatprep.mubr.msk.f32.mxu0 %vm176_vm0, %v177_v6 }
   0x2   :  { %v140_v4 = vpack.c.bf16 %v17_v1, %v16_v0  ;;  %v19_v5 = vld [vmem:[%s230_s1 + $0x18] sm:$0xff] }
   0x3   :  { %8 = vsyncpa [#allocation3], 0  ;;  %v143_v7 = vpack.c.bf16 %v19_v5, %v18_v2  ;;  %v15_v8 = vld [vmem:[%s229_s0] sm:$0xff]  ;;  %vm27_vm1 = vcmask 261120   ;;  %s178_s1 = smov [#allocation2]   ;;  %vm105_vm2 = vcmask 130048  }
   0x4   :  { %141 = vmatpush3.bf16.msra.mxu0 %v140_v4  ;;  %v121_v9 = vld [vmem:[%s231_s2] ss:$0 sm:$0xff]  ;;  %s113_s24 = sshll.u32 %s178_s1, 4  ;;  %s114_s24 = int_to_ptr.vmem [resolvable:$true] %s113_s24 }
   0x5   :  { %142 = vmatprep.subr.bf16.mxu0 %v175_v3  ;;  %s151_s0 = scalar_lea.vmem %s114_s24, 128  ;;  %p156_p1 = scmp.lt.s32.totalorder %s114_s24, %s114_s24 }
   0x6   :  { %p152_p0 = scmp.ne.s32.totalorder %s114_s24, %s151_s0  ;;  %p157_p2 = scmp.lt.s32.totalorder %s151_s0, %s151_s0 }
   0x8   :  { %144 = vmatpush3.bf16.msra.mxu0 %v143_v7  ;;  %p158_p3 = por %p157_p2, %p156_p1 }
   0xa   :  { %p159_p4 = pnand %p158_p3, %p152_p0 }
   0xb   :  { %137 = vmatmul.mubr.msk.f32.vlgmr.msra.gmra.mrb[0].mxu0 %vm27_vm1, %v15_v8 }
  0xde   :  { %v97_v10 = vpop.f32.mrb[0].mxu0 }
  0xdf   :  { %v98_v11 = vadd.f32 %v121_v9, %v97_v10  ;;  %v138_v12 = vpop.f32.mrb[1].mxu0 }
  0xe1   :  { %v101_v13 = vmul.f32 0.5, %v98_v11 }
  0xe3   :  { %149 = vtanh.f32 %v101_v13 }
  0xed   :  { %v150_v14 = vpop.eup %149 }
  0xee   :  { %v103_v15 = vmul.f32 0.5, %v150_v14 }
  0xf0   :  { %v104_v16 = vadd.f32 0.5, %v103_v15 }
  0xf2   :  { %106 = vst.msk [vmem:[#allocation2] sm:$0xff] %vm105_vm2, %v104_v16 }
  0xf3   :  { %162 = shalt.err (!%p159_p4)
}
  0xf4   :  { %s163_s26 = scalar_lea.hbm %s232_s3, 128 }
  0xf5   :  { %p164_p5 = scmp.ne.s32.totalorder %s232_s3, %s163_s26  ;;  %p167_p6 = scmp.lt.u32.totalorder %s163_s26, %s232_s3 }
  0xf7   :  { %p169_p7 = pnand %p167_p6, %p164_p5 }
  0xf9   :  { %172 = shalt.err (!%p169_p7)
}
  0xfa   :  { %116 = dma.vmem_to_hbm [thread:$0]  %s114_s24, 128, %s232_s3, [#allocation3]  }
  0xfb   :  { %173 = dma.done.wait [#allocation3], 128  }
  0xfc   :  { %174 = vsyncadd [#allocation3], 4294967168 }
  0xfd   :  { %120 = vsyncpa [#allocation3], 1 }

</bundles_post_ra>
